<compile_context>
chip_gen: v7x
topology: tpu7x:2x2x1
jax: 0.10.0
libtpu: 0.0.40
codegen_flags: <defaults>
</compile_context>

<pallas_src>
import functools
import math

import jax
import jax.numpy as jnp
from jax import lax
from jax.experimental import pallas as pl
from jax.experimental.pallas import tpu as pltpu


def _round_up(x: int, m: int) -> int:
    return ((x + m - 1) // m) * m


def _predicate_kernel(x_ref, noise_ref, w1t_ref, b1_ref, wd_ref, out_ref, *,
                      tau: float, hard: bool):
    # x_ref: (TILE_B, arg_dim) native layout.  Contract over arg_dim so the fc1
    # result is batch-on-lanes (hidden, TILE_B); any transpose Mosaic needs
    # happens in VMEM, never in HBM.
    h = lax.dot_general(
        w1t_ref[...], x_ref[...],
        dimension_numbers=(((1,), (1,)), ((), ())),
        preferred_element_type=jnp.float32)                   # (hidden, TILE_B)
    h = jnp.maximum(h + b1_ref[...], 0.0)

    # fc2 folded into a logit difference d = logits[:,1] - logits[:,0]:
    # one VPU multiply + one sublane reduce instead of an N=2 MXU matmul.
    d = jnp.sum(h * wd_ref[...], axis=0, keepdims=True)       # (1, TILE_B)

    # noise_ref already holds Logistic noise (== g1 - g0) plus (b2[1] - b2[0]).
    d = d + noise_ref[...]

    if hard:
        # one_hot(argmax(logits + g)): tau > 0 drops out; class 1 iff d > 0.
        out_ref[...] = (d > 0.0).astype(jnp.float32)
    else:
        # softmax over 2 classes == sigmoid((logit1 - logit0 + g1 - g0) / tau),
        # computed stably; exact reciprocal so [1-p, p] sums to 1 tightly.
        y = d * jnp.float32(1.0 / tau)
        neg = y < 0.0
        z = jnp.exp(jnp.where(neg, y, -y))                    # exp(-|y|)
        r = 1.0 / (1.0 + z)
        out_ref[...] = jnp.where(neg, 1.0 - r, r)


def _choose_tile_b(B: int, arg_dim: int) -> int:
    if B <= 512:
        # Single full-extent block: always layout-legal, grid=(1,).  (For such
        # small B an XLA-fused jnp path would also be competitive.)
        return B
    # VMEM guard (v5e's 16 MiB default scoped VMEM is the tightest):
    # double-buffered args tile = 2 * tile_b * arg_dim * 4 bytes <= ~8 MiB.
    max_by_vmem = max(128, ((8 * 1024 * 1024) // (8 * max(arg_dim, 1))) // 128 * 128)
    # >= 2 grid steps so dimension_semantics=("parallel",) can shard across the
    # two v7x TensorCores; cap at 4096 lanes to amortize the ~0.35 us/step
    # overhead without bloating VMEM.  Padding is bounded to < 1 tile because
    # Pallas masks the partial edge block (no explicit pB materialization).
    target = _round_up(pl.cdiv(B, 2), 128)
    return int(max(128, min(4096, max_by_vmem, target)))


def predicate_network_forward(args, w1, b1, w2, b2, key,
                              tau: float = 1.0, hard: bool = True,
                              tile_b: int | None = None):
    """PredicateNetwork forward.  args: (B, arg_dim) f32; w1: (arg_dim, hidden);
    b1: (hidden,); w2: (hidden, 2); b2: (2,).  Returns (B, 2) f32."""
    B, arg_dim = args.shape
    hidden = w1.shape[1]
    if tile_b is None:
        tile_b = _choose_tile_b(B, arg_dim)

    # Layout plumbing -- all O(hidden) sized except the (1, B) noise row.
    w1t = w1.T.astype(jnp.float32)                            # (hidden, arg_dim)
    b1c = b1.reshape(hidden, 1).astype(jnp.float32)
    wd = (w2[:, 1] - w2[:, 0]).reshape(hidden, 1).astype(jnp.float32)
    bd = (b2[1] - b2[0]).astype(jnp.float32)

    # Difference of two i.i.d. Gumbel(0,1) samples is Logistic(0,1): one uniform
    # per batch element instead of two Gumbels; fold the fc2 bias difference in.
    u = jax.random.uniform(key, (1, B), dtype=jnp.float32)
    noise = jnp.log(u + 1e-10) - jnp.log(1.0 - u + 1e-10) + bd

    kernel = functools.partial(_predicate_kernel, tau=float(tau), hard=bool(hard))

    p1 = pl.pallas_call(
        kernel,
        out_shape=jax.ShapeDtypeStruct((1, B), jnp.float32),
        grid=(pl.cdiv(B, tile_b),),
        in_specs=[
            pl.BlockSpec((tile_b, arg_dim), lambda i: (i, 0)),   # args tile (native)
            pl.BlockSpec((1, tile_b), lambda i: (0, i)),         # logistic noise + bd
            pl.BlockSpec((hidden, arg_dim), lambda i: (0, 0)),   # W1^T (VMEM resident)
            pl.BlockSpec((hidden, 1), lambda i: (0, 0)),         # b1
            pl.BlockSpec((hidden, 1), lambda i: (0, 0)),         # w2[:,1] - w2[:,0]
        ],
        out_specs=pl.BlockSpec((1, tile_b), lambda i: (0, i)),
        compiler_params=pltpu.CompilerParams(
            dimension_semantics=("parallel",)),
    )(args.astype(jnp.float32), noise, w1t, b1c, wd)

    p1 = p1[0]                                                 # (B,)
    return jnp.stack([1.0 - p1, p1], axis=-1)                  # (B, 2)


def _reference_forward(args, w1, b1, w2, b2, noise_row, tau, hard):
    """Pure-JAX reference with the same logistic noise."""
    h = jnp.maximum(args @ w1 + b1, 0.0)
    logits = h @ w2 + b2
    d = logits[:, 1] - logits[:, 0] + noise_row
    if hard:
        p1 = (d > 0.0).astype(jnp.float32)
    else:
        p1 = jax.nn.sigmoid(d / tau)
    return jnp.stack([1.0 - p1, p1], axis=-1)


def init_params(key, arg_dim: int, hidden_dim: int):
    """Deterministic init mimicking nn.Linear defaults (U(-1/sqrt(fan_in), ..))."""
    k1, k2, k3, k4 = jax.random.split(key, 4)
    bound1 = 1.0 / math.sqrt(arg_dim)
    bound2 = 1.0 / math.sqrt(hidden_dim)
    # stored as (in, out): transpose of PyTorch's (out, in) weight layout
    w1 = jax.random.uniform(k1, (arg_dim, hidden_dim), jnp.float32, -bound1, bound1)
    b1 = jax.random.uniform(k2, (hidden_dim,), jnp.float32, -bound1, bound1)
    w2 = jax.random.uniform(k3, (hidden_dim, 2), jnp.float32, -bound2, bound2)
    b2 = jax.random.uniform(k4, (2,), jnp.float32, -bound2, bound2)
    return w1, b1, w2, b2


if __name__ == "__main__":
    key = jax.random.PRNGKey(0)
    k_args, k_params, k_noise = jax.random.split(key, 3)

    B, ARG_DIM, HIDDEN = 8, 32, 32
    args = jax.random.normal(k_args, (B, ARG_DIM), dtype=jnp.float32)
    w1, b1, w2, b2 = init_params(k_params, ARG_DIM, HIDDEN)

    # Reference noise: identical to what the wrapper draws from k_noise.
    u = jax.random.uniform(k_noise, (1, B), dtype=jnp.float32)
    logistic = (jnp.log(u + 1e-10) - jnp.log(1.0 - u + 1e-10))[0]

    # hard=True path: exact one-hot rows matching the reference argmax.
    hard_out = predicate_network_forward(args, w1, b1, w2, b2, k_noise,
                                         tau=1.0, hard=True)
    hard_out = jax.block_until_ready(hard_out)
    ref_hard = _reference_forward(args, w1, b1, w2, b2, logistic, 1.0, True)
    assert hard_out.shape == (B, 2)
    assert bool(jnp.all(jnp.sum(hard_out, axis=-1) == 1.0))
    assert bool(jnp.all((hard_out == 0.0) | (hard_out == 1.0)))
    assert bool(jnp.all(jnp.argmax(hard_out, -1) == jnp.argmax(ref_hard, -1)))

    # hard=False path: valid 2-way softmax probabilities matching the reference.
    soft_out = predicate_network_forward(args, w1, b1, w2, b2, k_noise,
                                         tau=0.5, hard=False)
    soft_out = jax.block_until_ready(soft_out)
    ref_soft = _reference_forward(args, w1, b1, w2, b2, logistic, 0.5, False)
    assert soft_out.shape == (B, 2)
    assert bool(jnp.all(jnp.abs(jnp.sum(soft_out, axis=-1) - 1.0) < 1e-5))
    assert bool(jnp.all((soft_out >= 0.0) & (soft_out <= 1.0)))
    assert bool(jnp.max(jnp.abs(soft_out - ref_soft)) < 1e-4)

    print("KERNEL_OK")
</pallas_src>

<mosaic_0001>
module attributes {stable_mosaic.version = 11 : i64} {
  func.func @_predicate_kernel(%arg0: i32, %arg1: memref<8x32xf32, #tpu.memory_space<vmem>>, %arg2: memref<1x8xf32, #tpu.memory_space<vmem>>, %arg3: memref<32x32xf32, #tpu.memory_space<vmem>>, %arg4: memref<32x1xf32, #tpu.memory_space<vmem>>, %arg5: memref<32x1xf32, #tpu.memory_space<vmem>>, %arg6: memref<1x8xf32, #tpu.memory_space<vmem>>) attributes {dimension_semantics = [#tpu.dimension_semantics<parallel>], iteration_bounds = array<i64: 1>, scalar_prefetch = 0 : i64, scratch_operands = 0 : i64, tpu.core_type = #tpu.core_type<tc>, window_params = [{transform_indices = @transform_0, window_bounds = array<i64: 8, 32>}, {transform_indices = @transform_1, window_bounds = array<i64: 1, 8>}, {pipeline_mode = #tpu.pipeline_mode<synchronous>, transform_indices = @transform_2, window_bounds = array<i64: 32, 32>}, {pipeline_mode = #tpu.pipeline_mode<synchronous>, transform_indices = @transform_3, window_bounds = array<i64: 32, 1>}, {pipeline_mode = #tpu.pipeline_mode<synchronous>, transform_indices = @transform_4, window_bounds = array<i64: 32, 1>}, {transform_indices = @transform_5, window_bounds = array<i64: 1, 8>}]} {
    %c0 = arith.constant 0 : index
    %c0_0 = arith.constant 0 : index
    %0 = vector.load %arg3[%c0, %c0_0] : memref<32x32xf32, #tpu.memory_space<vmem>>, vector<32x32xf32>
    %c0_1 = arith.constant 0 : index
    %c0_2 = arith.constant 0 : index
    %1 = vector.load %arg1[%c0_1, %c0_2] : memref<8x32xf32, #tpu.memory_space<vmem>>, vector<8x32xf32>
    %cst = arith.constant dense<0.000000e+00> : vector<32x8xf32>
    %2 = tpu.matmul %0, %1, %cst {dimension_numbers = #tpu.dot_dimension_numbers<[1], [1], [0], [0], [0, 0, 1, 0], [], []>} : vector<32x32xf32>, vector<8x32xf32>, vector<32x8xf32> -> vector<32x8xf32>
    %c0_3 = arith.constant 0 : index
    %c0_4 = arith.constant 0 : index
    %3 = vector.load %arg4[%c0_3, %c0_4] : memref<32x1xf32, #tpu.memory_space<vmem>>, vector<32x1xf32>
    %4 = vector.broadcast %3 : vector<32x1xf32> to vector<32x8xf32>
    %5 = arith.addf %2, %4 : vector<32x8xf32>
    %cst_5 = arith.constant 0.000000e+00 : f32
    %6 = vector.broadcast %cst_5 : f32 to vector<32x8xf32>
    %7 = arith.maximumf %5, %6 : vector<32x8xf32>
    %c0_6 = arith.constant 0 : index
    %c0_7 = arith.constant 0 : index
    %8 = vector.load %arg5[%c0_6, %c0_7] : memref<32x1xf32, #tpu.memory_space<vmem>>, vector<32x1xf32>
    %9 = vector.broadcast %8 : vector<32x1xf32> to vector<32x8xf32>
    %10 = arith.mulf %7, %9 : vector<32x8xf32>
    %cst_8 = arith.constant dense<0.000000e+00> : vector<8xf32>
    %11 = vector.multi_reduction <add>, %10, %cst_8 [0] : vector<32x8xf32> to vector<8xf32>
    %12 = vector.shape_cast %11 : vector<8xf32> to vector<1x8xf32>
    %c0_9 = arith.constant 0 : index
    %c0_10 = arith.constant 0 : index
    %13 = vector.load %arg2[%c0_9, %c0_10] : memref<1x8xf32, #tpu.memory_space<vmem>>, vector<1x8xf32>
    %14 = arith.addf %12, %13 : vector<1x8xf32>
    %cst_11 = arith.constant 0.000000e+00 : f32
    %15 = vector.broadcast %cst_11 : f32 to vector<1x8xf32>
    %16 = arith.cmpf ogt, %14, %15 : vector<1x8xf32>
    %17 = arith.extui %16 : vector<1x8xi1> to vector<1x8xi32>
    %18 = arith.sitofp %17 : vector<1x8xi32> to vector<1x8xf32>
    %c0_12 = arith.constant 0 : index
    %c0_13 = arith.constant 0 : index
    %19 = vector.load %arg6[%c0_12, %c0_13] : memref<1x8xf32, #tpu.memory_space<vmem>>, vector<1x8xf32>
    tpu.vector_store %arg6[%c0_12, %c0_13], %18 {strides = array<i32>} : memref<1x8xf32, #tpu.memory_space<vmem>>, vector<1x8xf32>,
    return
  }
  func.func @transform_0(%arg0: i32) -> (i32, i32) {
    %c0_i32 = arith.constant 0 : i32
    %c0_i32_0 = arith.constant 0 : i32
    return %arg0, %c0_i32 : i32, i32
  }
  func.func @transform_1(%arg0: i32) -> (i32, i32) {
    %c0_i32 = arith.constant 0 : i32
    %c0_i32_0 = arith.constant 0 : i32
    return %c0_i32, %arg0 : i32, i32
  }
  func.func @transform_2(%arg0: i32) -> (i32, i32) {
    %c0_i32 = arith.constant 0 : i32
    %c0_i32_0 = arith.constant 0 : i32
    %c0_i32_1 = arith.constant 0 : i32
    return %c0_i32, %c0_i32_0 : i32, i32
  }
  func.func @transform_3(%arg0: i32) -> (i32, i32) {
    %c0_i32 = arith.constant 0 : i32
    %c0_i32_0 = arith.constant 0 : i32
    %c0_i32_1 = arith.constant 0 : i32
    return %c0_i32, %c0_i32_0 : i32, i32
  }
  func.func @transform_4(%arg0: i32) -> (i32, i32) {
    %c0_i32 = arith.constant 0 : i32
    %c0_i32_0 = arith.constant 0 : i32
    %c0_i32_1 = arith.constant 0 : i32
    return %c0_i32, %c0_i32_0 : i32, i32
  }
  func.func @transform_5(%arg0: i32) -> (i32, i32) {
    %c0_i32 = arith.constant 0 : i32
    %c0_i32_0 = arith.constant 0 : i32
    return %c0_i32, %arg0 : i32, i32
  }
}

</mosaic_0001>

<bundles_post_ra>
// kernel: tpu_custom_call.1
= control target key start
LH: loop header
LB: loop body
LE: loop exit
PB: predicated region body
PF: predicated region fallthrough
CT: control target
= control target key end

     0   :  { %vm50_vm0 = vcmask 261120   ;;  %v268_v7 = vmov 0   ;;  %s363_s0 = inlined_call_operand.vmem [shape: f32[8,32], index: 0, kind: input, shape index: {}]   ;;  %s364_s1 = inlined_call_operand.vmem [shape: f32[1,8], index: 1, kind: input, shape index: {}]   ;;  %s365_s2 = inlined_call_operand.vmem [shape: f32[32,32], index: 2, kind: input, shape index: {}]   ;;  %s366_s3 = inlined_call_operand.vmem [shape: f32[32,1], index: 3, kind: input, shape index: {}]   ;;  %s367_s4 = inlined_call_operand.vmem [shape: f32[32,1], index: 4, kind: input, shape index: {}]   ;;  %s368_s5 = inlined_call_operand.hbm [shape: f32[1,8], index: 5, kind: output, shape index: {}]  }
   0x1   :  { %v25_v0 = vld [vmem:[%s363_s0] sm:$0xff]  ;;  %v23_v2 = vld [vmem:[%s365_s2 + $0x10] sm:$0xff]  ;;  %v22_v3 = vld [vmem:[%s365_s2 + $0x8] sm:$0xff]  ;;  %242 = vset.pattern.permute.xlu0 %v268_v7  ;;  %243 = vset.pattern.permute.xlu1 %v268_v7 }
   0x2   :  { %v21_v1 = vld [vmem:[%s365_s2] sm:$0xff]  ;;  %229 = vmatprep.subr.msk.mxu0 %vm50_vm0, %v25_v0  ;;  %237 = vmatprep.subr.msk.mxu1 %vm50_vm0, %v25_v0  ;;  %v24_v4 = vld [vmem:[%s365_s2 + $0x18] sm:$0xff]  ;;  %v28_v6 = vld [vmem:[%s366_s3 + $0x10] sm:$0xff] }
   0x3   :  { %230 = vmatpush3.xpose.msk.msra.mxu0 %vm50_vm0, %v25_v0  ;;  %238 = vmatpush3.xpose.msk.msra.mxu1 %vm50_vm0, %v25_v0  ;;  %v26_v5 = vld [vmem:[%s366_s3] sm:$0xff] }
   0x4   :  { %231 = vmatprep.mubr.msk.f32.mxu0 %vm50_vm0, %v21_v1  ;;  %234 = vmatprep.mubr.msk.f32.mxu1 %vm50_vm0, %v23_v2 }
   0x5   :  { %10 = vsyncpa [#allocation3], 0  ;;  %32 = vperm.xlu0 %242, %v26_v5   ;;  %42 = vperm.xlu1 %243, %v28_v6   ;;  %v27_v8 = vld [vmem:[%s366_s3 + $0x8] sm:$0xff]  ;;  %v29_v9 = vld [vmem:[%s366_s3 + $0x18] sm:$0xff]  ;;  %vm183_vm1 = vcmask 64512   ;;  %s269_s17 = smov [#allocation2]  }
   0x6   :  { %232 = vmatmul.mubr.msk.f32.vlgmr.msra.gmra.mrb[0].mxu0 %vm50_vm0, %v22_v3  ;;  %235 = vmatmul.mubr.msk.f32.vlgmr.msra.gmra.mrb[0].mxu1 %vm50_vm0, %v24_v4  ;;  %v155_v10 = vld [vmem:[%s367_s4] sm:$0xff]  ;;  %v156_v11 = vld [vmem:[%s367_s4 + $0x8] sm:$0xff]  ;;  %v157_v12 = vld [vmem:[%s367_s4 + $0x10] sm:$0xff]  ;;  %s210_s18 = sshll.u32 %s269_s17, 4  ;;  %vm202_vm2 = vcmask 57344   ;;  %v270_v53 = vmov 0.0   ;;  %s211_s18 = int_to_ptr.vmem [resolvable:$true] %s210_s18 }
   0x7   :  { %v158_v13 = vld [vmem:[%s367_s4 + $0x18] sm:$0xff]  ;;  %v197_v50 = vld [vmem:[%s364_s1] sm:$0x1]  ;;  %s244_s19 = scalar_lea.vmem %s211_s18, 16  ;;  %s248_s20 = scalar_lea.vmem %s211_s18, 32 }
   0x8   :  { %p245_p0 = scmp.ne.s32.totalorder %s211_s18, %s244_s19  ;;  %p249_p1 = scmp.lt.s32.totalorder %s211_s18, %s211_s18 }
   0x9   :  { %37 = vperm.xlu0 %242, %v27_v8   ;;  %47 = vperm.xlu1 %243, %v29_v9   ;;  %p250_p2 = scmp.lt.s32.totalorder %s248_s20, %s244_s19 }
   0xb   :  { %p251_p3 = por %p250_p2, %p249_p1 }
   0xd   :  { %161 = vperm.xlu0 %242, %v155_v10   ;;  %166 = vperm.xlu1 %243, %v156_v11   ;;  %p252_p4 = pnand %p251_p3, %p245_p0 }
  0x11   :  { %171 = vperm.xlu0 %242, %v157_v12   ;;  %176 = vperm.xlu1 %243, %v158_v13  }
  0x84   :  { %v33_v14 = vpop.permute.xlu0 %32  ;;  %v43_v15 = vpop.permute.xlu1 %42 }
  0x88   :  { %v38_v16 = vpop.permute.xlu0 %37  ;;  %v48_v17 = vpop.permute.xlu1 %47 }
  0x8c   :  { %v162_v18 = vpop.permute.xlu0 %161  ;;  %v167_v19 = vpop.permute.xlu1 %166 }
  0x90   :  { %v172_v32 = vpop.permute.xlu0 %171  ;;  %v177_v36 = vpop.permute.xlu1 %176 }
  0xd9   :  { %v233_v20 = vpop.f32.mrb[0].mxu0  ;;  %v236_v21 = vpop.f32.mrb[0].mxu1 }
  0xda   :  { %v138_v22 = vadd.f32 %v233_v20, %v38_v16  ;;  %v148_v23 = vadd.f32 %v236_v21, %v48_v17  ;;  %v132_v24 = vpop.f32.mrb[1].mxu0  ;;  %v142_v25 = vpop.f32.mrb[1].mxu1 }
  0xdb   :  { %v133_v26 = vadd.f32 %v132_v24, %v33_v14  ;;  %v143_v27 = vadd.f32 %v142_v25, %v43_v15 }
  0xdc   :  { %v152_v28 = vmax.f32 %v138_v22, 0.0  ;;  %v154_v29 = vmax.f32 %v148_v23, 0.0 }
  0xdd   :  { %v151_v30 = vmax.f32 %v133_v26, 0.0  ;;  %v153_v31 = vmax.f32 %v143_v27, 0.0 }
  0xde   :  { %v180_v33 = vmul.f32 %v167_v19, %v152_v28  ;;  %v182_v38 = vmul.f32 %v177_v36, %v154_v29 }
  0xdf   :  { %v179_v34 = vmul.f32 %v162_v18, %v151_v30  ;;  %v181_v35 = vmul.f32 %v172_v32, %v153_v31 }
  0xe0   :  { %v185_v37 = vsel %vm183_vm1, %v180_v33, 0.0  ;;  %v189_v43 = vsel %vm183_vm1, %v182_v38, 0.0 }
  0xe1   :  { %v184_v39 = vsel %vm183_vm1, %v179_v34, 0.0  ;;  %v187_v41 = vsel %vm183_vm1, %v181_v35, 0.0 }
  0xe2   :  { %v186_v40 = vadd.f32 %v185_v37, %v184_v39 }
  0xe4   :  { %v188_v42 = vadd.f32 %v187_v41, %v186_v40 }
  0xe6   :  { %v190_v44 = vadd.f32 %v189_v43, %v188_v42 }
  0xe8   :  { %v191_v45 = vrot.slane %v190_v44, 4 }
  0xea   :  { %v192_v46 = vadd.f32 %v191_v45, %v190_v44 }
  0xec   :  { %v193_v47 = vrot.slane %v192_v46, 2 }
  0xee   :  { %v194_v48 = vadd.f32 %v193_v47, %v192_v46 }
  0xf0   :  { %v195_v49 = vrot.slane %v194_v48, 1 }
  0xf2   :  { %v196_v51 = vadd.f32 %v195_v49, %v194_v48 }
  0xf4   :  { %v198_v52 = vadd.f32 %v197_v50, %v196_v51 }
  0xf6   :  { %vm199_vm3 = vcmp.gt.f32.partialorder %v198_v52, 0.0 }
  0xf7   :  { %v223_v54 = vsel %vm199_vm3, 1.0, %v270_v53 }
  0xf8   :  { %203 = vst.msk [vmem:[#allocation2] sm:$0x1] %vm202_vm2, %v223_v54 }
  0xf9   :  { %255 = shalt.err (!%p252_p4)
}
  0xfa   :  { %s256_s22 = scalar_lea.hbm %s368_s5, 16 }
  0xfb   :  { %p257_p5 = scmp.ne.s32.totalorder %s368_s5, %s256_s22  ;;  %p260_p6 = scmp.lt.u32.totalorder %s256_s22, %s368_s5 }
  0xfd   :  { %p262_p7 = pnand %p260_p6, %p257_p5 }
  0xff   :  { %265 = shalt.err (!%p262_p7)
}
 0x100   :  { %213 = dma.vmem_to_hbm [thread:$0]  %s211_s18, 16, %s368_s5, [#allocation3]  }
 0x101   :  { %266 = dma.done.wait [#allocation3], 16  }
 0x102   :  { %267 = vsyncadd [#allocation3], 4294967280 }
 0x103   :  { %217 = vsyncpa [#allocation3], 1 }

</bundles_post_ra>
